<compile_context>
chip_gen: v7x
topology: tpu7x:2x2x1
jax: 0.10.0
libtpu: 0.0.40
codegen_flags: <defaults>
</compile_context>

<pallas_src>
import math

import jax
import jax.numpy as jnp
from jax.experimental import pallas as pl
from jax.experimental.pallas import tpu as pltpu

LANE = 128


def _round_up(n, m):
    return ((n + m - 1) // m) * m


def _pad2d(a, rows, cols):
    return jnp.pad(a, ((0, rows - a.shape[0]), (0, cols - a.shape[1])))


# ---------------- kernel 1: MLP stack + message / self projections (per node tile) -----------
def mlp_msg_kernel(x_ref, w1_ref, b1_ref, w2_ref, b2_ref, wm_ref, bm_ref, ws_ref, bs_ref,
                   msg_ref, upd_ref):
    h = jnp.dot(x_ref[...], w1_ref[...], preferred_element_type=jnp.float32) + b1_ref[...]
    h = jnp.maximum(h, 0.0)
    h = jnp.dot(h, w2_ref[...], preferred_element_type=jnp.float32) + b2_ref[...]
    h = jnp.maximum(h, 0.0)
    msg = jnp.dot(h, wm_ref[...], preferred_element_type=jnp.float32) + bm_ref[...]
    upd = jnp.dot(h, ws_ref[...], preferred_element_type=jnp.float32) + bs_ref[...]
    msg_ref[...] = msg.astype(msg_ref.dtype)   # bf16: halves the re-read stream in kernel 2
    upd_ref[...] = upd                         # f32: consumed once in the finalize step


# ---------------- kernel 2: tiled degree-normalized aggregation + self update + ReLU ---------
def aggregate_kernel(a_ref, msg_ref, deg_ref, upd_ref, o_ref, acc_ref):
    k = pl.program_id(1)

    @pl.when(k == 0)
    def _():
        acc_ref[...] = jnp.zeros_like(acc_ref)

    acc_ref[...] += jnp.dot(a_ref[...], msg_ref[...], preferred_element_type=jnp.float32)

    @pl.when(k == pl.num_programs(1) - 1)
    def _():
        inv_deg = pl.reciprocal(deg_ref[...], approx=True)   # f32 normalization on the EUP
        o_ref[...] = jnp.maximum(acc_ref[...] * inv_deg + upd_ref[...], 0.0)


def gnn_block_forward(x, edge_index, edge_weight, params, num_nodes,
                      tile_m=128, tile_k=128):
    """squeeze, pad to lane-dense shapes, run the two fused Pallas kernels, slice padding off."""
    # squeeze_dim(x): drop trailing singleton -> [num_nodes, backcast_length]
    x = jnp.squeeze(x, axis=-1).astype(jnp.float32)

    (w1, b1, w2, b2, wm, bm, ws, bs) = params
    L, H0 = w1.shape
    H1 = w2.shape[1]

    # lane-dense padding: feature dims -> multiples of 128, node dim -> tile multiple
    L_p = _round_up(L, LANE)
    H0_p = _round_up(H0, LANE)
    H1_p = _round_up(H1, LANE)
    N_p = _round_up(num_nodes, math.lcm(tile_m, tile_k))

    x_p = _pad2d(x, N_p, L_p)
    w1_p = _pad2d(w1, L_p, H0_p)
    b1_p = _pad2d(b1, 1, H0_p)
    w2_p = _pad2d(w2, H0_p, H1_p)
    b2_p = _pad2d(b2, 1, H1_p)
    wm_p = _pad2d(wm, H1_p, H1_p)
    bm_p = _pad2d(bm, 1, H1_p)
    ws_p = _pad2d(ws, H1_p, H1_p)
    bs_p = _pad2d(bs, 1, H1_p)

    # dense weighted adjacency (glue); degree kept separate, normalization happens in-kernel
    src = edge_index[0]
    dst = edge_index[1]
    if edge_weight is None:
        edge_weight = jnp.ones(src.shape[0], dtype=jnp.float32)
    A = jnp.zeros((N_p, N_p), jnp.float32).at[dst, src].add(edge_weight.astype(jnp.float32))
    deg = jnp.maximum(A.sum(axis=1, keepdims=True), 1.0)      # f32 [N_p, 1]
    A_bf16 = A.astype(jnp.bfloat16)                           # halve the dominant N^2 HBM stream

    n_m = N_p // tile_m
    n_k = N_p // tile_k
    vmem_limit = 32 * 1024 * 1024   # safe on v5e/v6e/v7x default scoped limits

    def full_spec(arr):
        return pl.BlockSpec(arr.shape, lambda i: (0, 0))

    # -------- kernel 1: per-node-tile MLP + projections (fully parallel over node tiles) ------
    msg, upd = pl.pallas_call(
        mlp_msg_kernel,
        out_shape=(jax.ShapeDtypeStruct((N_p, H1_p), jnp.bfloat16),
                   jax.ShapeDtypeStruct((N_p, H1_p), jnp.float32)),
        grid=(n_m,),
        in_specs=[pl.BlockSpec((tile_m, L_p), lambda i: (i, 0)),
                  full_spec(w1_p), full_spec(b1_p),
                  full_spec(w2_p), full_spec(b2_p),
                  full_spec(wm_p), full_spec(bm_p),
                  full_spec(ws_p), full_spec(bs_p)],
        out_specs=(pl.BlockSpec((tile_m, H1_p), lambda i: (i, 0)),
                   pl.BlockSpec((tile_m, H1_p), lambda i: (i, 0))),
        compiler_params=pltpu.CompilerParams(
            dimension_semantics=("parallel",),
            vmem_limit_bytes=vmem_limit),
        cost_estimate=pl.CostEstimate(
            flops=2 * N_p * (L_p * H0_p + H0_p * H1_p + 2 * H1_p * H1_p),
            transcendentals=0,
            bytes_accessed=4 * (N_p * L_p + L_p * H0_p + H0_p * H1_p + 2 * H1_p * H1_p
                                + N_p * H1_p) + 2 * N_p * H1_p),
    )(x_p, w1_p, b1_p, w2_p, b2_p, wm_p, bm_p, ws_p, bs_p)

    # -------- kernel 2: (i, k) tiled aggregation with f32 accumulator, normalize + ReLU -------
    out_p = pl.pallas_call(
        aggregate_kernel,
        out_shape=jax.ShapeDtypeStruct((N_p, H1_p), jnp.float32),
        grid=(n_m, n_k),
        in_specs=[pl.BlockSpec((tile_m, tile_k), lambda i, k: (i, k)),   # A tile      (bf16)
                  pl.BlockSpec((tile_k, H1_p), lambda i, k: (k, 0)),      # msg rows k  (bf16)
                  pl.BlockSpec((tile_m, 1), lambda i, k: (i, 0)),         # deg rows i  (f32)
                  pl.BlockSpec((tile_m, H1_p), lambda i, k: (i, 0))],     # upd rows i  (f32)
        out_specs=pl.BlockSpec((tile_m, H1_p), lambda i, k: (i, 0)),
        scratch_shapes=[pltpu.VMEM((tile_m, H1_p), jnp.float32)],
        compiler_params=pltpu.CompilerParams(
            dimension_semantics=("parallel", "arbitrary"),
            vmem_limit_bytes=vmem_limit),
        cost_estimate=pl.CostEstimate(
            flops=2 * N_p * N_p * H1_p + 2 * N_p * H1_p,
            transcendentals=N_p,
            bytes_accessed=2 * N_p * N_p + 2 * N_p * H1_p * n_m
                           + 4 * (2 * N_p * H1_p + N_p)),
    )(A_bf16, msg, deg, upd)

    # slice away node / feature padding
    return out_p[:num_nodes, :H1]


def _reference_forward(x, edge_index, edge_weight, params, num_nodes):
    """Pure-JAX reference (same assumed MPNN semantics) for a sanity check."""
    x = jnp.squeeze(x, axis=-1).astype(jnp.float32)
    (w1, b1, w2, b2, wm, bm, ws, bs) = params
    h = jnp.maximum(x @ w1 + b1, 0.0)
    h = jnp.maximum(h @ w2 + b2, 0.0)
    src, dst = edge_index[0], edge_index[1]
    if edge_weight is None:
        edge_weight = jnp.ones(src.shape[0], jnp.float32)
    A = jnp.zeros((num_nodes, num_nodes), jnp.float32).at[dst, src].add(edge_weight)
    deg = jnp.maximum(A.sum(axis=1, keepdims=True), 1.0)
    agg = (A / deg) @ (h @ wm + bm)
    return jnp.maximum(agg + h @ ws + bs, 0.0)


def make_params(key, backcast_length, n_theta_hidden):
    """Deterministic parameter init (shapes follow nn.Linear in the module)."""
    h0, h1 = n_theta_hidden
    ks = jax.random.split(key, 8)
    scale = 0.1
    w1 = scale * jax.random.normal(ks[0], (backcast_length, h0), jnp.float32)
    b1 = scale * jax.random.normal(ks[1], (1, h0), jnp.float32)
    w2 = scale * jax.random.normal(ks[2], (h0, h1), jnp.float32)
    b2 = scale * jax.random.normal(ks[3], (1, h1), jnp.float32)
    wm = scale * jax.random.normal(ks[4], (h1, h1), jnp.float32)
    bm = scale * jax.random.normal(ks[5], (1, h1), jnp.float32)
    ws = scale * jax.random.normal(ks[6], (h1, h1), jnp.float32)
    bs = scale * jax.random.normal(ks[7], (1, h1), jnp.float32)
    return (w1, b1, w2, b2, wm, bm, ws, bs)


if __name__ == "__main__":
    key = jax.random.PRNGKey(0)
    k_x, k_w, k_ew = jax.random.split(key, 3)

    num_nodes = 8
    backcast_length = 10
    forecast_length = 5
    n_theta_hidden = [32, 32]
    thetas_dim = [4, 8]  # theta_b_fc / theta_f_fc exist in __init__ but are unused in forward

    # Input consistent with squeeze_dim: [num_nodes, backcast_length, 1]
    x = jax.random.normal(k_x, (num_nodes, backcast_length, 1), jnp.float32)

    # Simple directed ring graph (both directions), E = 16 edges.
    src = jnp.concatenate([jnp.arange(num_nodes), jnp.arange(num_nodes)])
    dst = jnp.concatenate([(jnp.arange(num_nodes) + 1) % num_nodes,
                           (jnp.arange(num_nodes) - 1) % num_nodes])
    edge_index = jnp.stack([src, dst]).astype(jnp.int32)
    edge_weight = jax.random.uniform(k_ew, (edge_index.shape[1],), jnp.float32, 0.5, 1.5)

    params = make_params(k_w, backcast_length, n_theta_hidden)

    out = gnn_block_forward(x, edge_index, edge_weight, params, num_nodes)
    out = jax.block_until_ready(out)
    assert out.shape == (num_nodes, n_theta_hidden[-1])

    # Loose-tolerance sanity check against the pure-JAX reference (A stream is bf16 in-kernel).
    ref = _reference_forward(x, edge_index, edge_weight, params, num_nodes)
    assert jnp.allclose(out, ref, rtol=5e-2, atol=5e-2)

    print("KERNEL_OK")
</pallas_src>

<mosaic_0001>
module attributes {stable_mosaic.version = 11 : i64} {
  func.func @mlp_msg_kernel(%arg0: i32, %arg1: memref<128x128xf32, #tpu.memory_space<vmem>>, %arg2: memref<128x128xf32, #tpu.memory_space<vmem>>, %arg3: memref<1x128xf32, #tpu.memory_space<vmem>>, %arg4: memref<128x128xf32, #tpu.memory_space<vmem>>, %arg5: memref<1x128xf32, #tpu.memory_space<vmem>>, %arg6: memref<128x128xf32, #tpu.memory_space<vmem>>, %arg7: memref<1x128xf32, #tpu.memory_space<vmem>>, %arg8: memref<128x128xf32, #tpu.memory_space<vmem>>, %arg9: memref<1x128xf32, #tpu.memory_space<vmem>>, %arg10: memref<128x128xbf16, #tpu.memory_space<vmem>>, %arg11: memref<128x128xf32, #tpu.memory_space<vmem>>) attributes {dimension_semantics = [#tpu.dimension_semantics<parallel>], iteration_bounds = array<i64: 1>, scalar_prefetch = 0 : i64, scratch_operands = 0 : i64, tpu.core_type = #tpu.core_type<tc>, window_params = [{transform_indices = @transform_0, window_bounds = array<i64: 128, 128>}, {pipeline_mode = #tpu.pipeline_mode<synchronous>, transform_indices = @transform_1, window_bounds = array<i64: 128, 128>}, {pipeline_mode = #tpu.pipeline_mode<synchronous>, transform_indices = @transform_2, window_bounds = array<i64: 1, 128>}, {pipeline_mode = #tpu.pipeline_mode<synchronous>, transform_indices = @transform_3, window_bounds = array<i64: 128, 128>}, {pipeline_mode = #tpu.pipeline_mode<synchronous>, transform_indices = @transform_4, window_bounds = array<i64: 1, 128>}, {pipeline_mode = #tpu.pipeline_mode<synchronous>, transform_indices = @transform_5, window_bounds = array<i64: 128, 128>}, {pipeline_mode = #tpu.pipeline_mode<synchronous>, transform_indices = @transform_6, window_bounds = array<i64: 1, 128>}, {pipeline_mode = #tpu.pipeline_mode<synchronous>, transform_indices = @transform_7, window_bounds = array<i64: 128, 128>}, {pipeline_mode = #tpu.pipeline_mode<synchronous>, transform_indices = @transform_8, window_bounds = array<i64: 1, 128>}, {transform_indices = @transform_9, window_bounds = array<i64: 128, 128>}, {transform_indices = @transform_10, window_bounds = array<i64: 128, 128>}]} {
    %c0 = arith.constant 0 : index
    %c0_0 = arith.constant 0 : index
    %0 = vector.load %arg1[%c0, %c0_0] : memref<128x128xf32, #tpu.memory_space<vmem>>, vector<128x128xf32>
    %c0_1 = arith.constant 0 : index
    %c0_2 = arith.constant 0 : index
    %1 = vector.load %arg2[%c0_1, %c0_2] : memref<128x128xf32, #tpu.memory_space<vmem>>, vector<128x128xf32>
    %cst = arith.constant dense<0.000000e+00> : vector<128x128xf32>
    %2 = tpu.matmul %0, %1, %cst {dimension_numbers = #tpu.dot_dimension_numbers<[1], [0], [0], [1], [0, 0, 1, 1], [], []>} : vector<128x128xf32>, vector<128x128xf32>, vector<128x128xf32> -> vector<128x128xf32>
    %c0_3 = arith.constant 0 : index
    %c0_4 = arith.constant 0 : index
    %3 = vector.load %arg3[%c0_3, %c0_4] : memref<1x128xf32, #tpu.memory_space<vmem>>, vector<1x128xf32>
    %4 = vector.broadcast %3 : vector<1x128xf32> to vector<128x128xf32>
    %5 = arith.addf %2, %4 : vector<128x128xf32>
    %cst_5 = arith.constant 0.000000e+00 : f32
    %6 = vector.broadcast %cst_5 : f32 to vector<128x128xf32>
    %7 = arith.maximumf %5, %6 : vector<128x128xf32>
    %c0_6 = arith.constant 0 : index
    %c0_7 = arith.constant 0 : index
    %8 = vector.load %arg4[%c0_6, %c0_7] : memref<128x128xf32, #tpu.memory_space<vmem>>, vector<128x128xf32>
    %cst_8 = arith.constant dense<0.000000e+00> : vector<128x128xf32>
    %9 = tpu.matmul %7, %8, %cst_8 {dimension_numbers = #tpu.dot_dimension_numbers<[1], [0], [0], [1], [0, 0, 1, 1], [], []>} : vector<128x128xf32>, vector<128x128xf32>, vector<128x128xf32> -> vector<128x128xf32>
    %c0_9 = arith.constant 0 : index
    %c0_10 = arith.constant 0 : index
    %10 = vector.load %arg5[%c0_9, %c0_10] : memref<1x128xf32, #tpu.memory_space<vmem>>, vector<1x128xf32>
    %11 = vector.broadcast %10 : vector<1x128xf32> to vector<128x128xf32>
    %12 = arith.addf %9, %11 : vector<128x128xf32>
    %cst_11 = arith.constant 0.000000e+00 : f32
    %13 = vector.broadcast %cst_11 : f32 to vector<128x128xf32>
    %14 = arith.maximumf %12, %13 : vector<128x128xf32>
    %c0_12 = arith.constant 0 : index
    %c0_13 = arith.constant 0 : index
    %15 = vector.load %arg6[%c0_12, %c0_13] : memref<128x128xf32, #tpu.memory_space<vmem>>, vector<128x128xf32>
    %cst_14 = arith.constant dense<0.000000e+00> : vector<128x128xf32>
    %16 = tpu.matmul %14, %15, %cst_14 {dimension_numbers = #tpu.dot_dimension_numbers<[1], [0], [0], [1], [0, 0, 1, 1], [], []>} : vector<128x128xf32>, vector<128x128xf32>, vector<128x128xf32> -> vector<128x128xf32>
    %c0_15 = arith.constant 0 : index
    %c0_16 = arith.constant 0 : index
    %17 = vector.load %arg7[%c0_15, %c0_16] : memref<1x128xf32, #tpu.memory_space<vmem>>, vector<1x128xf32>
    %18 = vector.broadcast %17 : vector<1x128xf32> to vector<128x128xf32>
    %19 = arith.addf %16, %18 : vector<128x128xf32>
    %c0_17 = arith.constant 0 : index
    %c0_18 = arith.constant 0 : index
    %20 = vector.load %arg8[%c0_17, %c0_18] : memref<128x128xf32, #tpu.memory_space<vmem>>, vector<128x128xf32>
    %cst_19 = arith.constant dense<0.000000e+00> : vector<128x128xf32>
    %21 = tpu.matmul %14, %20, %cst_19 {dimension_numbers = #tpu.dot_dimension_numbers<[1], [0], [0], [1], [0, 0, 1, 1], [], []>} : vector<128x128xf32>, vector<128x128xf32>, vector<128x128xf32> -> vector<128x128xf32>
    %c0_20 = arith.constant 0 : index
    %c0_21 = arith.constant 0 : index
    %22 = vector.load %arg9[%c0_20, %c0_21] : memref<1x128xf32, #tpu.memory_space<vmem>>, vector<1x128xf32>
    %23 = vector.broadcast %22 : vector<1x128xf32> to vector<128x128xf32>
    %24 = arith.addf %21, %23 : vector<128x128xf32>
    %25 = arith.truncf %19 : vector<128x128xf32> to vector<128x128xbf16>
    %c0_22 = arith.constant 0 : index
    %c0_23 = arith.constant 0 : index
    %26 = vector.load %arg10[%c0_22, %c0_23] : memref<128x128xbf16, #tpu.memory_space<vmem>>, vector<128x128xbf16>
    tpu.vector_store %arg10[%c0_22, %c0_23], %25 {strides = array<i32>} : memref<128x128xbf16, #tpu.memory_space<vmem>>, vector<128x128xbf16>,
    %c0_24 = arith.constant 0 : index
    %c0_25 = arith.constant 0 : index
    %27 = vector.load %arg11[%c0_24, %c0_25] : memref<128x128xf32, #tpu.memory_space<vmem>>, vector<128x128xf32>
    tpu.vector_store %arg11[%c0_24, %c0_25], %24 {strides = array<i32>} : memref<128x128xf32, #tpu.memory_space<vmem>>, vector<128x128xf32>,
    return
  }
  func.func @transform_0(%arg0: i32) -> (i32, i32) {
    %c0_i32 = arith.constant 0 : i32
    %c0_i32_0 = arith.constant 0 : i32
    return %arg0, %c0_i32 : i32, i32
  }
  func.func @transform_1(%arg0: i32) -> (i32, i32) {
    %c0_i32 = arith.constant 0 : i32
    %c0_i32_0 = arith.constant 0 : i32
    %c0_i32_1 = arith.constant 0 : i32
    return %c0_i32, %c0_i32_0 : i32, i32
  }
  func.func @transform_2(%arg0: i32) -> (i32, i32) {
    %c0_i32 = arith.constant 0 : i32
    %c0_i32_0 = arith.constant 0 : i32
    %c0_i32_1 = arith.constant 0 : i32
    return %c0_i32, %c0_i32_0 : i32, i32
  }
  func.func @transform_3(%arg0: i32) -> (i32, i32) {
    %c0_i32 = arith.constant 0 : i32
    %c0_i32_0 = arith.constant 0 : i32
    %c0_i32_1 = arith.constant 0 : i32
    return %c0_i32, %c0_i32_0 : i32, i32
  }
  func.func @transform_4(%arg0: i32) -> (i32, i32) {
    %c0_i32 = arith.constant 0 : i32
    %c0_i32_0 = arith.constant 0 : i32
    %c0_i32_1 = arith.constant 0 : i32
    return %c0_i32, %c0_i32_0 : i32, i32
  }
  func.func @transform_5(%arg0: i32) -> (i32, i32) {
    %c0_i32 = arith.constant 0 : i32
    %c0_i32_0 = arith.constant 0 : i32
    %c0_i32_1 = arith.constant 0 : i32
    return %c0_i32, %c0_i32_0 : i32, i32
  }
  func.func @transform_6(%arg0: i32) -> (i32, i32) {
    %c0_i32 = arith.constant 0 : i32
    %c0_i32_0 = arith.constant 0 : i32
    %c0_i32_1 = arith.constant 0 : i32
    return %c0_i32, %c0_i32_0 : i32, i32
  }
  func.func @transform_7(%arg0: i32) -> (i32, i32) {
    %c0_i32 = arith.constant 0 : i32
    %c0_i32_0 = arith.constant 0 : i32
    %c0_i32_1 = arith.constant 0 : i32
    return %c0_i32, %c0_i32_0 : i32, i32
  }
  func.func @transform_8(%arg0: i32) -> (i32, i32) {
    %c0_i32 = arith.constant 0 : i32
    %c0_i32_0 = arith.constant 0 : i32
    %c0_i32_1 = arith.constant 0 : i32
    return %c0_i32, %c0_i32_0 : i32, i32
  }
  func.func @transform_9(%arg0: i32) -> (i32, i32) {
    %c0_i32 = arith.constant 0 : i32
    %c0_i32_0 = arith.constant 0 : i32
    return %arg0, %c0_i32 : i32, i32
  }
  func.func @transform_10(%arg0: i32) -> (i32, i32) {
    %c0_i32 = arith.constant 0 : i32
    %c0_i32_0 = arith.constant 0 : i32
    return %arg0, %c0_i32 : i32, i32
  }
}

</mosaic_0001>

<bundles_post_ra>
// kernel: tpu_custom_call.1
= control target key start
LH: loop header
LB: loop body
LE: loop exit
PB: predicated region body
PF: predicated region fallthrough
CT: control target
= control target key end

     0   :  { %16 = vsyncpa [#allocation3], 0  ;;  %s1966_s0 = inlined_call_operand.hbm [shape: f32[128,128], index: 0, kind: input, shape index: {}]   ;;  %s1967_s1 = inlined_call_operand.hbm [shape: f32[128,128], index: 1, kind: input, shape index: {}]   ;;  %s1968_s2 = inlined_call_operand.vmem [shape: f32[1,128], index: 2, kind: input, shape index: {}]   ;;  %s1969_s3 = inlined_call_operand.hbm [shape: f32[128,128], index: 3, kind: input, shape index: {}]   ;;  %s1970_s4 = inlined_call_operand.vmem [shape: f32[1,128], index: 4, kind: input, shape index: {}]   ;;  %s1971_s5 = inlined_call_operand.hbm [shape: f32[128,128], index: 5, kind: input, shape index: {}]   ;;  %s1972_s6 = inlined_call_operand.vmem [shape: f32[1,128], index: 6, kind: input, shape index: {}]   ;;  %s1973_s7 = inlined_call_operand.hbm [shape: f32[128,128], index: 7, kind: input, shape index: {}]   ;;  %s1974_s8 = inlined_call_operand.vmem [shape: f32[1,128], index: 8, kind: input, shape index: {}]   ;;  %s1975_s9 = inlined_call_operand.hbm [shape: bf16[128,128], index: 9, kind: output, shape index: {0}]   ;;  %s1976_s10 = inlined_call_operand.hbm [shape: f32[128,128], index: 10, kind: output, shape index: {1}]  }
   0x1   :  { %17 = vsyncpa [#allocation6], 0 }
   0x2   :  { %18 = vsyncpa [#allocation9], 0 }
   0x3   :  { %19 = vsyncpa [#allocation4], 0 }
   0x4   :  { %20 = vsyncpa [#allocation13], 0  ;;  %s1693_s13 = smov [#allocation5]   ;;  %s1694_s15 = smov [#allocation8]  }
   0x5   :  { %s38_s14 = sshll.u32 %s1693_s13, 4  ;;  %s66_s16 = sshll.u32 %s1694_s15, 4  ;;  %s39_s14 = int_to_ptr.vmem [resolvable:$true] %s38_s14  ;;  %s1759_s16 = int_to_ptr.vmem [resolvable:$true] %s66_s16 }
   0x6   :  { %s1529_s19 = scalar_lea.hbm %s1967_s1, 2048 }
   0x7   :  { %p1530_p0 = scmp.ne.s32.totalorder %s1967_s1, %s1529_s19  ;;  %p1533_p1 = scmp.lt.u32.totalorder %s1529_s19, %s1967_s1 }
   0x9   :  { %p1535_p2 = pnand %p1533_p1, %p1530_p0 }
   0xb   :  { %1538 = shalt.err (!%p1535_p2)
}
   0xc   :  { %s1539_s24 = scalar_lea.vmem %s39_s14, 2048  ;;  %p1544_p4 = scmp.lt.s32.totalorder %s39_s14, %s39_s14 }
   0xd   :  { %p1540_p3 = scmp.ne.s32.totalorder %s39_s14, %s1539_s24  ;;  %p1545_p5 = scmp.lt.s32.totalorder %s1539_s24, %s1539_s24 }
   0xf   :  { %p1546_p6 = por %p1545_p5, %p1544_p4 }
  0x11   :  { %p1547_p7 = pnand %p1546_p6, %p1540_p3 }
  0x13   :  { %1550 = shalt.err (!%p1547_p7)
}
  0x14   :  { %s1695_s25 = smov 128   ;;  %s1696_s26 = smov 8  }
  0x15   :  { %44 = dma.hbm_to_vmem [thread:$0]  %s1967_s1, 2048, %s39_s14, [#allocation6], %s1695_s25, %s1695_s25, %s1696_s26  }
  0x16   :  { %s1551_s11 = scalar_lea.hbm %s1971_s5, 2048 }
  0x17   :  { %p1552_p8 = scmp.ne.s32.totalorder %s1971_s5, %s1551_s11  ;;  %p1555_p9 = scmp.lt.u32.totalorder %s1551_s11, %s1971_s5 }
  0x19   :  { %p1557_p10 = pnand %p1555_p9, %p1552_p8 }
  0x1b   :  { %1560 = shalt.err (!%p1557_p10)
}
  0x1c   :  { %s1561_s18 = scalar_lea.vmem %s1759_s16, 2048  ;;  %p1566_p12 = scmp.lt.s32.totalorder %s1759_s16, %s1759_s16 }
  0x1d   :  { %p1562_p11 = scmp.ne.s32.totalorder %s1759_s16, %s1561_s18  ;;  %p1567_p13 = scmp.lt.s32.totalorder %s1561_s18, %s1561_s18 }
  0x1f   :  { %p1568_p0 = por %p1567_p13, %p1566_p12 }
  0x21   :  { %p1569_p1 = pnand %p1568_p0, %p1562_p11 }
  0x23   :  { %1572 = shalt.err (!%p1569_p1)
}
  0x24   :  { %72 = dma.hbm_to_vmem [thread:$0]  %s1971_s5, 2048, %s1759_s16, [#allocation9], %s1695_s25, %s1695_s25, %s1696_s26  }
  0x25   :  { %s1697_s19 = smov [#allocation2]   ;;  %s1698_s21 = smov [#allocation7]  }
  0x26   :  { %s26_s20 = sshll.u32 %s1697_s19, 4  ;;  %s52_s22 = sshll.u32 %s1698_s21, 4  ;;  %s27_s20 = int_to_ptr.vmem [resolvable:$true] %s26_s20  ;;  %s1796_s22 = int_to_ptr.vmem [resolvable:$true] %s52_s22 }
  0x27   :  { %s1573_s27 = scalar_lea.hbm %s1966_s0, 2048 }
  0x28   :  { %p1574_p2 = scmp.ne.s32.totalorder %s1966_s0, %s1573_s27  ;;  %p1577_p3 = scmp.lt.u32.totalorder %s1573_s27, %s1966_s0 }
  0x2a   :  { %p1579_p4 = pnand %p1577_p3, %p1574_p2 }
  0x2c   :  { %1582 = shalt.err (!%p1579_p4)
}
  0x2d   :  { %s1583_s5 = scalar_lea.vmem %s27_s20, 2048  ;;  %p1588_p6 = scmp.lt.s32.totalorder %s27_s20, %s27_s20 }
  0x2e   :  { %p1584_p5 = scmp.ne.s32.totalorder %s27_s20, %s1583_s5  ;;  %p1589_p7 = scmp.lt.s32.totalorder %s1583_s5, %s1583_s5 }
  0x30   :  { %p1590_p8 = por %p1589_p7, %p1588_p6 }
  0x32   :  { %p1591_p9 = pnand %p1590_p8, %p1584_p5 }
  0x34   :  { %1594 = shalt.err (!%p1591_p9)
}
  0x35   :  { %32 = dma.hbm_to_vmem [thread:$0]  %s1966_s0, 2048, %s27_s20, [#allocation3], %s1695_s25, %s1695_s25, %s1696_s26  }
  0x36   :  { %s1595_s17 = scalar_lea.hbm %s1969_s3, 2048 }
  0x37   :  { %p1596_p10 = scmp.ne.s32.totalorder %s1969_s3, %s1595_s17  ;;  %p1599_p11 = scmp.lt.u32.totalorder %s1595_s17, %s1969_s3 }
  0x39   :  { %p1601_p12 = pnand %p1599_p11, %p1596_p10 }
  0x3b   :  { %1604 = shalt.err (!%p1601_p12)
}
  0x3c   :  { %s1605_s21 = scalar_lea.vmem %s1796_s22, 2048  ;;  %p1610_p0 = scmp.lt.s32.totalorder %s1796_s22, %s1796_s22 }
  0x3d   :  { %p1606_p13 = scmp.ne.s32.totalorder %s1796_s22, %s1605_s21  ;;  %p1611_p1 = scmp.lt.s32.totalorder %s1605_s21, %s1605_s21 }
  0x3f   :  { %p1612_p2 = por %p1611_p1, %p1610_p0 }
  0x41   :  { %p1613_p3 = pnand %p1612_p2, %p1606_p13 }
  0x43   :  { %1616 = shalt.err (!%p1613_p3)
}
  0x44   :  { %58 = dma.hbm_to_vmem [thread:$0]  %s1969_s3, 2048, %s1796_s22, [#allocation6], %s1695_s25, %s1695_s25, %s1696_s26  }
  0x45   :  { %s1699_s23 = smov [#allocation10]   ;;  %s1617_s29 = scalar_lea.hbm %s1973_s7, 2048 }
  0x46   :  { %s80_s24 = sshll.u32 %s1699_s23, 4  ;;  %p1618_p4 = scmp.ne.s32.totalorder %s1973_s7, %s1617_s29  ;;  %s81_s24 = int_to_ptr.vmem [resolvable:$true] %s80_s24 }
  0x47   :  { %p1621_p5 = scmp.lt.u32.totalorder %s1617_s29, %s1973_s7 }
  0x49   :  { %p1623_p6 = pnand %p1621_p5, %p1618_p4 }
  0x4b   :  { %1626 = shalt.err (!%p1623_p6)
}
  0x4c   :  { %s1627_s12 = scalar_lea.vmem %s81_s24, 2048  ;;  %p1632_p8 = scmp.lt.s32.totalorder %s81_s24, %s81_s24 }
  0x4d   :  { %p1628_p7 = scmp.ne.s32.totalorder %s81_s24, %s1627_s12  ;;  %p1633_p9 = scmp.lt.s32.totalorder %s1627_s12, %s1627_s12 }
  0x4f   :  { %p1634_p10 = por %p1633_p9, %p1632_p8 }
  0x51   :  { %p1635_p11 = pnand %p1634_p10, %p1628_p7 }
  0x53   :  { %1638 = shalt.err (!%p1635_p11)
}
  0x54   :  { %86 = dma.hbm_to_vmem [thread:$0]  %s1973_s7, 2048, %s81_s24, [#allocation9], %s1695_s25, %s1695_s25, %s1696_s26  }
  0x55   :  { %1683 = dma.done.wait [#allocation3], 2048  }
  0x56   :  { %1684 = vsyncadd [#allocation3], 4294965248 }
  0x57   :  { %1685 = dma.done.wait [#allocation6], 4096  }
  0x58   :  { %1686 = vsyncadd [#allocation6], 4294963200 }
  0x59   :  { %1687 = dma.done.wait [#allocation9], 4096  }
  0x5a   :  { %1688 = vsyncadd [#allocation9], 4294963200  ;;  %v120_v0 = vld [vmem:[#allocation5] sm:$0xff]  ;;  %v121_v1 = vld [vmem:[#allocation5 + $0x8] sm:$0xff]  ;;  %s1701_s14 = smov [#allocation11]  }
  0x5b   :  { %v122_v2 = vld [vmem:[#allocation5 + $0x10] sm:$0xff]  ;;  %v1390_v3 = vpack.c.bf16 %v121_v1, %v120_v0  ;;  %v123_v4 = vld [vmem:[#allocation5 + $0x18] sm:$0xff]  ;;  %v124_v6 = vld [vmem:[#allocation5 + $0x20] sm:$0xff]  ;;  %s925_s19 = sshll.u32 %s1701_s14, 4  ;;  %s1932_s19 = int_to_ptr.vmem [resolvable:$true] %s925_s19 }
  0x5c   :  { %v1394_v5 = vpack.c.bf16 %v123_v4, %v122_v2  ;;  %v125_v7 = vld [vmem:[#allocation5 + $0x28] sm:$0xff]  ;;  %v104_v9 = vld [vmem:[#allocation2] sm:$0xff]  ;;  %v126_v10 = vld [vmem:[#allocation5 + $0x30] sm:$0xff] }
  0x5d   :  { %1391 = vmatprep.subr.bf16.mxu0 %v1390_v3  ;;  %v1398_v8 = vpack.c.bf16 %v125_v7, %v124_v6  ;;  %v127_v11 = vld [vmem:[#allocation5 + $0x38] sm:$0xff]  ;;  %1198 = vmatprep.mubr.f32.mxu0 %v104_v9  ;;  %v128_v13 = vld [vmem:[#allocation5 + $0x40] sm:$0xff]  ;;  %v129_v14 = vld [vmem:[#allocation5 + $0x48] sm:$0xff] }
  0x5e   :  { %1393 = vmatpush3.bf16.msra.mxu0 %v1390_v3  ;;  %v1402_v12 = vpack.c.bf16 %v127_v11, %v126_v10  ;;  %v304_v15 = vld [vmem:[#allocation7] sm:$0xff]  ;;  %v305_v16 = vld [vmem:[#allocation7 + $0x8] sm:$0xff]  ;;  %v306_v17 = vld [vmem:[#allocation7 + $0x10] sm:$0xff]  ;;  %v1406_v21 = vpack.c.bf16 %v129_v14, %v128_v13 }
  0x5f   :  { %1395 = vmatprep.subr.bf16.mxu0 %v1394_v5  ;;  %v307_v18 = vld [vmem:[#allocation7 + $0x18] sm:$0xff]  ;;  %v1422_v19 = vpack.c.bf16 %v305_v16, %v304_v15  ;;  %v308_v22 = vld [vmem:[#allocation7 + $0x20] sm:$0xff]  ;;  %v309_v23 = vld [vmem:[#allocation7 + $0x28] sm:$0xff] }
  0x60   :  { %v1426_v20 = vpack.c.bf16 %v307_v18, %v306_v17  ;;  %v130_v24 = vld [vmem:[#allocation5 + $0x50] sm:$0xff]  ;;  %v131_v25 = vld [vmem:[#allocation5 + $0x58] sm:$0xff]  ;;  %v1430_v26 = vpack.c.bf16 %v309_v23, %v308_v22  ;;  %v132_v30 = vld [vmem:[#allocation5 + $0x60] sm:$0xff] }
  0x61   :  { %1423 = vmatprep.subr.bf16.mxu1 %v1422_v19  ;;  %v1410_v27 = vpack.c.bf16 %v131_v25, %v130_v24  ;;  %v310_v28 = vld [vmem:[#allocation7 + $0x30] sm:$0xff]  ;;  %v311_v29 = vld [vmem:[#allocation7 + $0x38] sm:$0xff]  ;;  %v133_v31 = vld [vmem:[#allocation5 + $0x68] sm:$0xff] }
  0x62   :  { %1397 = vmatpush3.bf16.msra.mxu0 %v1394_v5  ;;  %1425 = vmatpush3.bf16.msra.mxu1 %v1422_v19  ;;  %v1434_v32 = vpack.c.bf16 %v311_v29, %v310_v28  ;;  %v1414_v33 = vpack.c.bf16 %v133_v31, %v132_v30  ;;  %v312_v34 = vld [vmem:[#allocation7 + $0x40] sm:$0xff]  ;;  %v313_v35 = vld [vmem:[#allocation7 + $0x48] sm:$0xff]  ;;  %v134_v36 = vld [vmem:[#allocation5 + $0x70] sm:$0xff] }
  0x63   :  { %1399 = vmatprep.subr.bf16.mxu0 %v1398_v8  ;;  %1427 = vmatprep.subr.bf16.mxu1 %v1426_v20  ;;  %v135_v37 = vld [vmem:[#allocation5 + $0x78] sm:$0xff]  ;;  %v1438_v38 = vpack.c.bf16 %v313_v35, %v312_v34  ;;  %v314_v40 = vld [vmem:[#allocation7 + $0x50] sm:$0xff]  ;;  %v316_v43 = vld [vmem:[#allocation7 + $0x60] sm:$0xff] }
  0x64   :  { %v1418_v39 = vpack.c.bf16 %v135_v37, %v134_v36  ;;  %v315_v41 = vld [vmem:[#allocation7 + $0x58] sm:$0xff]  ;;  %v317_v44 = vld [vmem:[#allocation7 + $0x68] sm:$0xff]  ;;  %v106_v47 = vld [vmem:[#allocation2 + $0x10] sm:$0xff] }
  0x65   :  { %v1442_v42 = vpack.c.bf16 %v315_v41, %v314_v40  ;;  %v105_v45 = vld [vmem:[#allocation2 + $0x8] sm:$0xff]  ;;  %v1446_v46 = vpack.c.bf16 %v317_v44, %v316_v43  ;;  %v107_v48 = vld [vmem:[#allocation2 + $0x18] sm:$0xff]  ;;  %v108_v49 = vld [vmem:[#allocation2 + $0x20] sm:$0xff] }
  0x66   :  { %1401 = vmatpush3.bf16.msra.mxu0 %v1398_v8  ;;  %1429 = vmatpush3.bf16.msra.mxu1 %v1426_v20  ;;  %v109_v50 = vld [vmem:[#allocation2 + $0x28] sm:$0xff]  ;;  %v110_v51 = vld [vmem:[#allocation2 + $0x30] sm:$0xff]  ;;  %v111_v52 = vld [vmem:[#allocation2 + $0x38] sm:$0xff] }
  0x67   :  { %1403 = vmatprep.subr.bf16.mxu0 %v1402_v12  ;;  %1431 = vmatprep.subr.bf16.mxu1 %v1430_v26  ;;  %v112_v53 = vld [vmem:[#allocation2 + $0x40] sm:$0xff]  ;;  %v113_v54 = vld [vmem:[#allocation2 + $0x48] sm:$0xff]  ;;  %v114_v55 = vld [vmem:[#allocation2 + $0x50] sm:$0xff] }
  0x68   :  { %v115_v56 = vld [vmem:[#allocation2 + $0x58] sm:$0xff]  ;;  %v116_v57 = vld [vmem:[#allocation2 + $0x60] sm:$0xff]  ;;  %v117_v58 = vld [vmem:[#allocation2 + $0x68] sm:$0xff] }
  0x69   :  { %v118_v59 = vld [vmem:[#allocation2 + $0x70] sm:$0xff]  ;;  %v119_v60 = vld [vmem:[#allocation2 + $0x78] sm:$0xff]  ;;  %v488_v0 = vld [vmem:[#allocation8] sm:$0xff] }
  0x6a   :  { %1405 = vmatpush3.bf16.msra.mxu0 %v1402_v12  ;;  %1433 = vmatpush3.bf16.msra.mxu1 %v1430_v26  ;;  %v318_v61 = vld [vmem:[#allocation7 + $0x70] sm:$0xff]  ;;  %v319_v62 = vld [vmem:[#allocation7 + $0x78] sm:$0xff]  ;;  %v489_v1 = vld [vmem:[#allocation8 + $0x8] sm:$0xff] }
  0x6b   :  { %1407 = vmatprep.subr.bf16.mxu0 %v1406_v21  ;;  %1435 = vmatprep.subr.bf16.mxu1 %v1434_v32  ;;  %v1450_v63 = vpack.c.bf16 %v319_v62, %v318_v61  ;;  %v656_v2 = vld [vmem:[#allocation10] sm:$0xff]  ;;  %v1454_v3 = vpack.c.bf16 %v489_v1, %v488_v0  ;;  %v657_v4 = vld [vmem:[#allocation10 + $0x8] sm:$0xff]  ;;  %v490_v5 = vld [vmem:[#allocation8 + $0x10] sm:$0xff] }
  0x6c   :  { %v491_v6 = vld [vmem:[#allocation8 + $0x18] sm:$0xff]  ;;  %v1486_v7 = vpack.c.bf16 %v657_v4, %v656_v2  ;;  %v492_v9 = vld [vmem:[#allocation8 + $0x20] sm:$0xff]  ;;  %v493_v10 = vld [vmem:[#allocation8 + $0x28] sm:$0xff] }
  0x6d   :  { %v1458_v8 = vpack.c.bf16 %v491_v6, %v490_v5  ;;  %v1462_v11 = vpack.c.bf16 %v493_v10, %v492_v9  ;;  %v494_v12 = vld [vmem:[#allocation8 + $0x30] sm:$0xff]  ;;  %v495_v13 = vld [vmem:[#allocation8 + $0x38] sm:$0xff]  ;;  %v496_v15 = vld [vmem:[#allocation8 + $0x40] sm:$0xff] }
  0x6e   :  { %1409 = vmatpush3.bf16.msra.mxu0 %v1406_v21  ;;  %1437 = vmatpush3.bf16.msra.mxu1 %v1434_v32  ;;  %v1466_v14 = vpack.c.bf16 %v495_v13, %v494_v12  ;;  %v497_v16 = vld [vmem:[#allocation8 + $0x48] sm:$0xff]  ;;  %v498_v18 = vld [vmem:[#allocation8 + $0x50] sm:$0xff]  ;;  %v499_v19 = vld [vmem:[#allocation8 + $0x58] sm:$0xff] }
  0x6f   :  { %1411 = vmatprep.subr.bf16.mxu0 %v1410_v27  ;;  %1439 = vmatprep.subr.bf16.mxu1 %v1438_v38  ;;  %v1470_v17 = vpack.c.bf16 %v497_v16, %v496_v15  ;;  %v1474_v20 = vpack.c.bf16 %v499_v19, %v498_v18  ;;  %v500_v21 = vld [vmem:[#allocation8 + $0x60] sm:$0xff]  ;;  %v501_v22 = vld [vmem:[#allocation8 + $0x68] sm:$0xff]  ;;  %v658_v29 = vld [vmem:[#allocation10 + $0x10] sm:$0xff] }
  0x70   :  { %v1478_v23 = vpack.c.bf16 %v501_v22, %v500_v21  ;;  %v1851_v24 = vld [vmem:[%s1968_s2] ss:$0 sm:$0xff]  ;;  %v659_v30 = vld [vmem:[#allocation10 + $0x18] sm:$0xff]  ;;  %v666_v1 = vld [vmem:[#allocation10 + $0x50] sm:$0xff] }
  0x71   :  { %v1490_v36 = vpack.c.bf16 %v659_v30, %v658_v29  ;;  %v667_v2 = vld [vmem:[#allocation10 + $0x58] sm:$0xff]  ;;  %v668_v10 = vld [vmem:[#allocation10 + $0x60] sm:$0xff] }
  0x72   :  { %1413 = vmatpush3.bf16.msra.mxu0 %v1410_v27  ;;  %1441 = vmatpush3.bf16.msra.mxu1 %v1438_v38  ;;  %v660_v38 = vld [vmem:[#allocation10 + $0x20] sm:$0xff]  ;;  %v503_v29 = vld [vmem:[#allocation8 + $0x78] sm:$0xff] }
  0x73   :  { %1415 = vmatprep.subr.bf16.mxu0 %v1414_v33  ;;  %1443 = vmatprep.subr.bf16.mxu1 %v1442_v42 }
  0x76   :  { %1417 = vmatpush3.bf16.msra.mxu0 %v1414_v33  ;;  %1445 = vmatpush3.bf16.msra.mxu1 %v1442_v42 }
  0x77   :  { %1419 = vmatprep.subr.bf16.mxu0 %v1418_v39  ;;  %1447 = vmatprep.subr.bf16.mxu1 %v1446_v46 }
  0x7a   :  { %1421 = vmatpush3.bf16.msra.mxu0 %v1418_v39  ;;  %1449 = vmatpush3.bf16.msra.mxu1 %v1446_v46  ;;  %v661_v39 = vld [vmem:[#allocation10 + $0x28] sm:$0xff] }
  0x7b   :  { %1451 = vmatprep.subr.bf16.mxu1 %v1450_v63  ;;  %1455 = vmatprep.subr.bf16.mxu0 %v1454_v3 }
  0x7d   :  { %1199 = vmatmul.mubr.f32.vlgmr.msra.gmra.mrb[0].mxu0 %v105_v45  ;;  %v1494_v45 = vpack.c.bf16 %v661_v39, %v660_v38 }
  0x7e   :  { %1201 = vmatprep.mubr.f32.mxu0 %v106_v47  ;;  %1453 = vmatpush3.bf16.msra.mxu1 %v1450_v63  ;;  %v662_v47 = vld [vmem:[#allocation10 + $0x30] sm:$0xff] }
  0x7f   :  { %1457 = vmatpush3.bf16.msra.mxu0 %v1454_v3  ;;  %1487 = vmatprep.subr.bf16.mxu1 %v1486_v7 }
  0x80   :  { %1459 = vmatprep.subr.bf16.mxu0 %v1458_v8 }
  0x81   :  { %1202 = vmatmul.mubr.f32.gmra.mrb[2].mxu0 %v107_v48  ;;  %v663_v48 = vld [vmem:[#allocation10 + $0x38] sm:$0xff] }
  0x82   :  { %1204 = vmatprep.mubr.f32.mxu0 %v108_v49 }
  0x83   :  { %1461 = vmatpush3.bf16.msra.mxu0 %v1458_v8  ;;  %v1506_v8 = vpack.c.bf16 %v667_v2, %v666_v1 }
  0x84   :  { %1463 = vmatprep.subr.bf16.mxu0 %v1462_v11 }
  0x85   :  { %1205 = vmatmul.mubr.f32.gmra.mrb[4].mxu0 %v109_v50 }
  0x86   :  { %1207 = vmatprep.mubr.f32.mxu0 %v110_v51 }
  0x87   :  { %1465 = vmatpush3.bf16.msra.mxu0 %v1462_v11  ;;  %v669_v11 = vld [vmem:[#allocation10 + $0x68] sm:$0xff] }
  0x88   :  { %1467 = vmatprep.subr.bf16.mxu0 %v1466_v14 }
  0x89   :  { %1208 = vmatmul.mubr.f32.gmra.mrb[6].mxu0 %v111_v52 }
  0x8a   :  { %1210 = vmatprep.mubr.f32.mxu0 %v112_v53 }
  0x8b   :  { %1469 = vmatpush3.bf16.msra.mxu0 %v1466_v14 }
  0x8c   :  { %1471 = vmatprep.subr.bf16.mxu0 %v1470_v17 }
  0x8d   :  { %1211 = vmatmul.mubr.f32.gmra.mrb[8].mxu0 %v113_v54  ;;  %v1498_v54 = vpack.c.bf16 %v663_v48, %v662_v47 }
  0x8e   :  { %1213 = vmatprep.mubr.f32.mxu0 %v114_v55 }
  0x8f   :  { %1473 = vmatpush3.bf16.msra.mxu0 %v1470_v17  ;;  %v1510_v17 = vpack.c.bf16 %v669_v11, %v668_v10 }
  0x90   :  { %1475 = vmatprep.subr.bf16.mxu0 %v1474_v20 }
  0x91   :  { %1214 = vmatmul.mubr.f32.gmra.mrb[10].mxu0 %v115_v56  ;;  %v664_v56 = vld [vmem:[#allocation10 + $0x40] sm:$0xff] }
  0x92   :  { %1216 = vmatprep.mubr.f32.mxu0 %v116_v57  ;;  %v665_v57 = vld [vmem:[#allocation10 + $0x48] sm:$0xff] }
  0x93   :  { %1477 = vmatpush3.bf16.msra.mxu0 %v1474_v20  ;;  %v1502_v63 = vpack.c.bf16 %v665_v57, %v664_v56 }
  0x94   :  { %1479 = vmatprep.subr.bf16.mxu0 %v1478_v23 }
  0x95   :  { %1217 = vmatmul.mubr.f32.gmra.mrb[12].mxu0 %v117_v58 }
  0x96   :  { %1219 = vmatprep.mubr.f32.mxu0 %v118_v59 }
  0x97   :  { %1481 = vmatpush3.bf16.msra.mxu0 %v1478_v23 }
  0x99   :  { %1220 = vmatmul.mubr.f32.gmra.mrb[14].mxu0 %v119_v60 }
 0x150   :  { %v1200_v25 = vpop.f32.mrb[0].mxu0 }
 0x151   :  { %v215_v26 = vadd.f32 %v1200_v25, %v1851_v24  ;;  %v209_v27 = vpop.f32.mrb[1].mxu0 }
 0x152   :  { %v210_v28 = vadd.f32 %v1851_v24, %v209_v27 }
 0x153   :  { %v289_v33 = vmax.f32 %v215_v26, 0.0 }
 0x154   :  { %v1203_v31 = vpop.f32.mrb[2].mxu0  ;;  %v288_v32 = vmax.f32 %v210_v28, 0.0  ;;  %v502_v28 = vld [vmem:[#allocation8 + $0x70] sm:$0xff] }
 0x155   :  { %v225_v34 = vadd.f32 %v1203_v31, %v1851_v24  ;;  %v219_v35 = vpop.f32.mrb[3].mxu0  ;;  %v1482_v30 = vpack.c.bf16 %v503_v29, %v502_v28  ;;  %v670_v31 = vld [vmem:[#allocation10 + $0x70] sm:$0xff] }
 0x156   :  { %v220_v37 = vadd.f32 %v1851_v24, %v219_v35  ;;  %1254 = vmatprep.mubr.f32.mxu1 %v288_v32  ;;  %v671_v32 = vld [vmem:[#allocation10 + $0x78] sm:$0xff] }
 0x157   :  { %1255 = vmatmul.mubr.f32.vlgmr.msra.gmra.mrb[0].mxu1 %v289_v33  ;;  %v291_v42 = vmax.f32 %v225_v34, 0.0  ;;  %v1514_v33 = vpack.c.bf16 %v671_v32, %v670_v31  ;;  %1483 = vmatprep.subr.bf16.mxu0 %v1482_v30 }
 0x158   :  { %v290_v40 = vmax.f32 %v220_v37, 0.0  ;;  %v1206_v41 = vpop.f32.mrb[4].mxu0  ;;  %1489 = vmatpush3.bf16.msra.mxu1 %v1486_v7  ;;  %1485 = vmatpush3.bf16.msra.mxu0 %v1482_v30 }
 0x159   :  { %v235_v43 = vadd.f32 %v1206_v41, %v1851_v24  ;;  %v229_v44 = vpop.f32.mrb[5].mxu0  ;;  %1491 = vmatprep.subr.bf16.mxu1 %v1490_v36 }
 0x15a   :  { %v230_v46 = vadd.f32 %v1851_v24, %v229_v44  ;;  %1257 = vmatprep.mubr.f32.mxu1 %v290_v40 }
 0x15b   :  { %1258 = vmatmul.mubr.f32.gmra.mrb[2].mxu1 %v291_v42  ;;  %v293_v51 = vmax.f32 %v235_v43, 0.0 }
 0x15c   :  { %v292_v49 = vmax.f32 %v230_v46, 0.0  ;;  %v1209_v50 = vpop.f32.mrb[6].mxu0  ;;  %1493 = vmatpush3.bf16.msra.mxu1 %v1490_v36 }
 0x15d   :  { %v245_v52 = vadd.f32 %v1209_v50, %v1851_v24  ;;  %v239_v53 = vpop.f32.mrb[7].mxu0  ;;  %1495 = vmatprep.subr.bf16.mxu1 %v1494_v45 }
 0x15e   :  { %v240_v55 = vadd.f32 %v1851_v24, %v239_v53  ;;  %1260 = vmatprep.mubr.f32.mxu1 %v292_v49 }
 0x15f   :  { %1261 = vmatmul.mubr.f32.gmra.mrb[4].mxu1 %v293_v51  ;;  %v295_v60 = vmax.f32 %v245_v52, 0.0 }
 0x160   :  { %v294_v58 = vmax.f32 %v240_v55, 0.0  ;;  %v1212_v59 = vpop.f32.mrb[8].mxu0  ;;  %1497 = vmatpush3.bf16.msra.mxu1 %v1494_v45 }
 0x161   :  { %v255_v61 = vadd.f32 %v1212_v59, %v1851_v24  ;;  %v249_v62 = vpop.f32.mrb[9].mxu0  ;;  %1499 = vmatprep.subr.bf16.mxu1 %v1498_v54 }
 0x162   :  { %v250_v0 = vadd.f32 %v1851_v24, %v249_v62  ;;  %1263 = vmatprep.mubr.f32.mxu1 %v294_v58 }
 0x163   :  { %1264 = vmatmul.mubr.f32.gmra.mrb[6].mxu1 %v295_v60  ;;  %v297_v5 = vmax.f32 %v255_v61, 0.0 }
 0x164   :  { %v296_v3 = vmax.f32 %v250_v0, 0.0  ;;  %v1215_v4 = vpop.f32.mrb[10].mxu0  ;;  %1501 = vmatpush3.bf16.msra.mxu1 %v1498_v54 }
 0x165   :  { %v265_v6 = vadd.f32 %v1215_v4, %v1851_v24  ;;  %v259_v7 = vpop.f32.mrb[11].mxu0  ;;  %1503 = vmatprep.subr.bf16.mxu1 %v1502_v63 }
 0x166   :  { %v260_v9 = vadd.f32 %v1851_v24, %v259_v7  ;;  %1266 = vmatprep.mubr.f32.mxu1 %v296_v3 }
 0x167   :  { %1267 = vmatmul.mubr.f32.gmra.mrb[8].mxu1 %v297_v5  ;;  %v299_v14 = vmax.f32 %v265_v6, 0.0 }
 0x168   :  { %v298_v12 = vmax.f32 %v260_v9, 0.0  ;;  %v1218_v13 = vpop.f32.mrb[12].mxu0  ;;  %1505 = vmatpush3.bf16.msra.mxu1 %v1502_v63 }
 0x169   :  { %v275_v15 = vadd.f32 %v1218_v13, %v1851_v24  ;;  %v269_v16 = vpop.f32.mrb[13].mxu0  ;;  %1507 = vmatprep.subr.bf16.mxu1 %v1506_v8 }
 0x16a   :  { %v270_v18 = vadd.f32 %v1851_v24, %v269_v16  ;;  %1269 = vmatprep.mubr.f32.mxu1 %v298_v12 }
 0x16b   :  { %1270 = vmatmul.mubr.f32.gmra.mrb[10].mxu1 %v299_v14  ;;  %v301_v21 = vmax.f32 %v275_v15, 0.0 }
 0x16c   :  { %v300_v19 = vmax.f32 %v270_v18, 0.0  ;;  %v1221_v20 = vpop.f32.mrb[14].mxu0  ;;  %1509 = vmatpush3.bf16.msra.mxu1 %v1506_v8  ;;  %v1893_v18 = vld [vmem:[%s1972_s6] ss:$0 sm:$0xff]  ;;  %s1700_s6 = smov [#allocation12]  }
 0x16d   :  { %v285_v22 = vadd.f32 %v1221_v20, %v1851_v24  ;;  %v279_v23 = vpop.f32.mrb[15].mxu0  ;;  %1511 = vmatprep.subr.bf16.mxu1 %v1510_v17 }
 0x16e   :  { %v280_v25 = vadd.f32 %v1851_v24, %v279_v23  ;;  %1272 = vmatprep.mubr.f32.mxu1 %v300_v19  ;;  %v1872_v24 = vld [vmem:[%s1970_s4] ss:$0 sm:$0xff] }
 0x16f   :  { %1273 = vmatmul.mubr.f32.gmra.mrb[12].mxu1 %v301_v21  ;;  %v303_v27 = vmax.f32 %v285_v22, 0.0  ;;  %v1898_v19 = vld [vmem:[%s1974_s8] ss:$0 sm:$0xff]  ;;  %s937_s8 = sshll.u32 %s1700_s6, 4  ;;  %s938_s8 = int_to_ptr.vmem [resolvable:$true] %s937_s8 }
 0x170   :  { %v302_v26 = vmax.f32 %v280_v25, 0.0  ;;  %1513 = vmatpush3.bf16.msra.mxu1 %v1510_v17  ;;  %s1639_s21 = scalar_lea.vmem %s938_s8, 2048  ;;  %p1644_p13 = scmp.lt.s32.totalorder %s938_s8, %s938_s8 }
 0x171   :  { %1515 = vmatprep.subr.bf16.mxu1 %v1514_v33  ;;  %p1640_p12 = scmp.ne.s32.totalorder %s938_s8, %s1639_s21  ;;  %p1645_p0 = scmp.lt.s32.totalorder %s1639_s21, %s1639_s21 }
 0x172   :  { %1275 = vmatprep.mubr.f32.mxu1 %v302_v26 }
 0x173   :  { %1276 = vmatmul.mubr.f32.gmra.mrb[14].mxu1 %v303_v27  ;;  %p1646_p1 = por %p1645_p0, %p1644_p13 }
 0x174   :  { %1517 = vmatpush3.bf16.msra.mxu1 %v1514_v33 }
 0x175   :  { %p1647_p2 = pnand %p1646_p1, %p1640_p12 }
 0x22a   :  { %v1256_v34 = vpop.f32.mrb[0].mxu1 }
 0x22b   :  { %v399_v35 = vadd.f32 %v1256_v34, %v1872_v24  ;;  %v393_v36 = vpop.f32.mrb[1].mxu1 }
 0x22c   :  { %v394_v37 = vadd.f32 %v1872_v24, %v393_v36 }
 0x22d   :  { %v473_v40 = vmax.f32 %v399_v35, 0.0 }
 0x22e   :  { %v472_v38 = vmax.f32 %v394_v37, 0.0  ;;  %v1259_v39 = vpop.f32.mrb[2].mxu1 }
 0x22f   :  { %v409_v41 = vadd.f32 %v1259_v39, %v1872_v24  ;;  %v403_v42 = vpop.f32.mrb[3].mxu1 }
 0x230   :  { %v404_v43 = vadd.f32 %v1872_v24, %v403_v42  ;;  %1310 = vmatprep.mubr.f32.mxu0 %v472_v38  ;;  %1366 = vmatprep.mubr.f32.mxu1 %v472_v38 }
 0x231   :  { %1311 = vmatmul.mubr.f32.vlgmr.msra.gmra.mrb[16].mxu0 %v473_v40  ;;  %1367 = vmatmul.mubr.f32.vlgmr.msra.gmra.mrb[16].mxu1 %v473_v40  ;;  %v475_v46 = vmax.f32 %v409_v41, 0.0 }
 0x232   :  { %v474_v44 = vmax.f32 %v404_v43, 0.0  ;;  %v1262_v45 = vpop.f32.mrb[4].mxu1 }
 0x233   :  { %v419_v47 = vadd.f32 %v1262_v45, %v1872_v24  ;;  %v413_v48 = vpop.f32.mrb[5].mxu1 }
 0x234   :  { %v414_v49 = vadd.f32 %v1872_v24, %v413_v48  ;;  %1313 = vmatprep.mubr.f32.mxu0 %v474_v44  ;;  %1369 = vmatprep.mubr.f32.mxu1 %v474_v44 }
 0x235   :  { %1314 = vmatmul.mubr.f32.gmra.mrb[18].mxu0 %v475_v46  ;;  %1370 = vmatmul.mubr.f32.gmra.mrb[18].mxu1 %v475_v46  ;;  %v477_v52 = vmax.f32 %v419_v47, 0.0 }
 0x236   :  { %v476_v50 = vmax.f32 %v414_v49, 0.0  ;;  %v1265_v51 = vpop.f32.mrb[6].mxu1 }
 0x237   :  { %v429_v53 = vadd.f32 %v1265_v51, %v1872_v24  ;;  %v423_v54 = vpop.f32.mrb[7].mxu1 }
 0x238   :  { %v424_v55 = vadd.f32 %v1872_v24, %v423_v54  ;;  %1316 = vmatprep.mubr.f32.mxu0 %v476_v50  ;;  %1372 = vmatprep.mubr.f32.mxu1 %v476_v50 }
 0x239   :  { %1317 = vmatmul.mubr.f32.gmra.mrb[20].mxu0 %v477_v52  ;;  %1373 = vmatmul.mubr.f32.gmra.mrb[20].mxu1 %v477_v52  ;;  %v479_v58 = vmax.f32 %v429_v53, 0.0 }
 0x23a   :  { %v478_v56 = vmax.f32 %v424_v55, 0.0  ;;  %v1268_v57 = vpop.f32.mrb[8].mxu1 }
 0x23b   :  { %v439_v59 = vadd.f32 %v1268_v57, %v1872_v24  ;;  %v433_v60 = vpop.f32.mrb[9].mxu1 }
 0x23c   :  { %v434_v61 = vadd.f32 %v1872_v24, %v433_v60  ;;  %1319 = vmatprep.mubr.f32.mxu0 %v478_v56  ;;  %1375 = vmatprep.mubr.f32.mxu1 %v478_v56 }
 0x23d   :  { %1320 = vmatmul.mubr.f32.gmra.mrb[22].mxu0 %v479_v58  ;;  %1376 = vmatmul.mubr.f32.gmra.mrb[22].mxu1 %v479_v58  ;;  %v481_v0 = vmax.f32 %v439_v59, 0.0 }
 0x23e   :  { %v480_v62 = vmax.f32 %v434_v61, 0.0  ;;  %v1271_v63 = vpop.f32.mrb[10].mxu1 }
 0x23f   :  { %v449_v1 = vadd.f32 %v1271_v63, %v1872_v24  ;;  %v443_v2 = vpop.f32.mrb[11].mxu1 }
 0x240   :  { %v444_v3 = vadd.f32 %v1872_v24, %v443_v2  ;;  %1322 = vmatprep.mubr.f32.mxu0 %v480_v62  ;;  %1378 = vmatprep.mubr.f32.mxu1 %v480_v62 }
 0x241   :  { %1323 = vmatmul.mubr.f32.gmra.mrb[24].mxu0 %v481_v0  ;;  %1379 = vmatmul.mubr.f32.gmra.mrb[24].mxu1 %v481_v0  ;;  %v483_v6 = vmax.f32 %v449_v1, 0.0 }
 0x242   :  { %v482_v4 = vmax.f32 %v444_v3, 0.0  ;;  %v1274_v5 = vpop.f32.mrb[12].mxu1 }
 0x243   :  { %v459_v7 = vadd.f32 %v1274_v5, %v1872_v24  ;;  %v453_v8 = vpop.f32.mrb[13].mxu1 }
 0x244   :  { %v454_v9 = vadd.f32 %v1872_v24, %v453_v8  ;;  %1325 = vmatprep.mubr.f32.mxu0 %v482_v4  ;;  %1381 = vmatprep.mubr.f32.mxu1 %v482_v4 }
 0x245   :  { %1326 = vmatmul.mubr.f32.gmra.mrb[26].mxu0 %v483_v6  ;;  %1382 = vmatmul.mubr.f32.gmra.mrb[26].mxu1 %v483_v6  ;;  %v485_v12 = vmax.f32 %v459_v7, 0.0 }
 0x246   :  { %v484_v10 = vmax.f32 %v454_v9, 0.0  ;;  %v1277_v11 = vpop.f32.mrb[14].mxu1 }
 0x247   :  { %v469_v13 = vadd.f32 %v1277_v11, %v1872_v24  ;;  %v463_v14 = vpop.f32.mrb[15].mxu1 }
 0x248   :  { %v464_v15 = vadd.f32 %v1872_v24, %v463_v14  ;;  %1328 = vmatprep.mubr.f32.mxu0 %v484_v10  ;;  %1384 = vmatprep.mubr.f32.mxu1 %v484_v10 }
 0x249   :  { %1329 = vmatmul.mubr.f32.gmra.mrb[28].mxu0 %v485_v12  ;;  %1385 = vmatmul.mubr.f32.gmra.mrb[28].mxu1 %v485_v12  ;;  %v487_v17 = vmax.f32 %v469_v13, 0.0 }
 0x24a   :  { %v486_v16 = vmax.f32 %v464_v15, 0.0 }
 0x24c   :  { %1331 = vmatprep.mubr.f32.mxu0 %v486_v16  ;;  %1387 = vmatprep.mubr.f32.mxu1 %v486_v16 }
 0x24d   :  { %1332 = vmatmul.mubr.f32.gmra.mrb[30].mxu0 %v487_v17  ;;  %1388 = vmatmul.mubr.f32.gmra.mrb[30].mxu1 %v487_v17 }
 0x304   :  { %v1312_v20 = vpop.f32.mrb[16].mxu0  ;;  %v1368_v21 = vpop.f32.mrb[16].mxu1 }
 0x305   :  { %v583_v22 = vadd.f32 %v1312_v20, %v1893_v18  ;;  %v751_v23 = vadd.f32 %v1368_v21, %v1898_v19  ;;  %v577_v25 = vpop.f32.mrb[17].mxu0  ;;  %v745_v26 = vpop.f32.mrb[17].mxu1 }
 0x306   :  { %v578_v27 = vadd.f32 %v1893_v18, %v577_v25  ;;  %v746_v28 = vadd.f32 %v1898_v19, %v745_v26 }
 0x307   :  { %905 = vst [vmem:[#allocation12 + $0x8] sm:$0xff] %v751_v23 }
 0x308   :  { %v994_v29 = vpack.c.bf16 %v583_v22, %v578_v27  ;;  %904 = vst [vmem:[#allocation12] sm:$0xff] %v746_v28  ;;  %v1315_v30 = vpop.f32.mrb[18].mxu0  ;;  %v1371_v31 = vpop.f32.mrb[18].mxu1 }
 0x309   :  { %v593_v32 = vadd.f32 %v1315_v30, %v1893_v18  ;;  %v761_v33 = vadd.f32 %v1371_v31, %v1898_v19  ;;  %v587_v24 = vpop.f32.mrb[19].mxu0  ;;  %v755_v34 = vpop.f32.mrb[19].mxu1 }
 0x30a   :  { %995 = vst [vmem:[#allocation11] sm:$0xff] %v994_v29   ;;  %v588_v35 = vadd.f32 %v1893_v18, %v587_v24  ;;  %v756_v36 = vadd.f32 %v1898_v19, %v755_v34 }
 0x30b   :  { %907 = vst [vmem:[#allocation12 + $0x18] sm:$0xff] %v761_v33 }
 0x30c   :  { %v999_v37 = vpack.c.bf16 %v593_v32, %v588_v35  ;;  %906 = vst [vmem:[#allocation12 + $0x10] sm:$0xff] %v756_v36  ;;  %v1318_v38 = vpop.f32.mrb[20].mxu0  ;;  %v1374_v39 = vpop.f32.mrb[20].mxu1 }
 0x30d   :  { %v603_v40 = vadd.f32 %v1318_v38, %v1893_v18  ;;  %v771_v41 = vadd.f32 %v1374_v39, %v1898_v19  ;;  %v597_v42 = vpop.f32.mrb[21].mxu0  ;;  %v765_v43 = vpop.f32.mrb[21].mxu1 }
 0x30e   :  { %1031 = vst [vmem:[#allocation11 + $0x8] sm:$0xff] %v999_v37   ;;  %v598_v44 = vadd.f32 %v1893_v18, %v597_v42  ;;  %v766_v45 = vadd.f32 %v1898_v19, %v765_v43 }
 0x30f   :  { %909 = vst [vmem:[#allocation12 + $0x28] sm:$0xff] %v771_v41 }
 0x310   :  { %v1004_v46 = vpack.c.bf16 %v603_v40, %v598_v44  ;;  %908 = vst [vmem:[#allocation12 + $0x20] sm:$0xff] %v766_v45  ;;  %v1321_v47 = vpop.f32.mrb[22].mxu0  ;;  %v1377_v48 = vpop.f32.mrb[22].mxu1 }
 0x311   :  { %v613_v49 = vadd.f32 %v1321_v47, %v1893_v18  ;;  %v781_v50 = vadd.f32 %v1377_v48, %v1898_v19  ;;  %v607_v51 = vpop.f32.mrb[23].mxu0  ;;  %v775_v52 = vpop.f32.mrb[23].mxu1 }
 0x312   :  { %1032 = vst [vmem:[#allocation11 + $0x10] sm:$0xff] %v1004_v46   ;;  %v608_v53 = vadd.f32 %v1893_v18, %v607_v51  ;;  %v776_v54 = vadd.f32 %v1898_v19, %v775_v52 }
 0x313   :  { %911 = vst [vmem:[#allocation12 + $0x38] sm:$0xff] %v781_v50 }
 0x314   :  { %v1009_v55 = vpack.c.bf16 %v613_v49, %v608_v53  ;;  %910 = vst [vmem:[#allocation12 + $0x30] sm:$0xff] %v776_v54  ;;  %v1324_v56 = vpop.f32.mrb[24].mxu0  ;;  %v1380_v57 = vpop.f32.mrb[24].mxu1 }
 0x315   :  { %v623_v58 = vadd.f32 %v1324_v56, %v1893_v18  ;;  %v791_v59 = vadd.f32 %v1380_v57, %v1898_v19  ;;  %v617_v60 = vpop.f32.mrb[25].mxu0  ;;  %v785_v61 = vpop.f32.mrb[25].mxu1 }
 0x316   :  { %1033 = vst [vmem:[#allocation11 + $0x18] sm:$0xff] %v1009_v55   ;;  %v618_v62 = vadd.f32 %v1893_v18, %v617_v60  ;;  %v786_v63 = vadd.f32 %v1898_v19, %v785_v61 }
 0x317   :  { %913 = vst [vmem:[#allocation12 + $0x48] sm:$0xff] %v791_v59 }
 0x318   :  { %v1014_v0 = vpack.c.bf16 %v623_v58, %v618_v62  ;;  %912 = vst [vmem:[#allocation12 + $0x40] sm:$0xff] %v786_v63  ;;  %v1327_v1 = vpop.f32.mrb[26].mxu0  ;;  %v1383_v2 = vpop.f32.mrb[26].mxu1 }
 0x319   :  { %v633_v3 = vadd.f32 %v1327_v1, %v1893_v18  ;;  %v801_v4 = vadd.f32 %v1383_v2, %v1898_v19  ;;  %v627_v5 = vpop.f32.mrb[27].mxu0  ;;  %v795_v6 = vpop.f32.mrb[27].mxu1 }
 0x31a   :  { %1034 = vst [vmem:[#allocation11 + $0x20] sm:$0xff] %v1014_v0   ;;  %v628_v7 = vadd.f32 %v1893_v18, %v627_v5  ;;  %v796_v8 = vadd.f32 %v1898_v19, %v795_v6 }
 0x31b   :  { %915 = vst [vmem:[#allocation12 + $0x58] sm:$0xff] %v801_v4 }
 0x31c   :  { %v1019_v9 = vpack.c.bf16 %v633_v3, %v628_v7  ;;  %914 = vst [vmem:[#allocation12 + $0x50] sm:$0xff] %v796_v8  ;;  %v1330_v10 = vpop.f32.mrb[28].mxu0  ;;  %v1386_v11 = vpop.f32.mrb[28].mxu1 }
 0x31d   :  { %v643_v12 = vadd.f32 %v1330_v10, %v1893_v18  ;;  %v811_v13 = vadd.f32 %v1386_v11, %v1898_v19  ;;  %v637_v14 = vpop.f32.mrb[29].mxu0  ;;  %v805_v15 = vpop.f32.mrb[29].mxu1 }
 0x31e   :  { %1035 = vst [vmem:[#allocation11 + $0x28] sm:$0xff] %v1019_v9   ;;  %v638_v16 = vadd.f32 %v1893_v18, %v637_v14  ;;  %v806_v17 = vadd.f32 %v1898_v19, %v805_v15 }
 0x31f   :  { %917 = vst [vmem:[#allocation12 + $0x68] sm:$0xff] %v811_v13 }
 0x320   :  { %v1024_v20 = vpack.c.bf16 %v643_v12, %v638_v16  ;;  %916 = vst [vmem:[#allocation12 + $0x60] sm:$0xff] %v806_v17  ;;  %v1333_v21 = vpop.f32.mrb[30].mxu0  ;;  %v1389_v22 = vpop.f32.mrb[30].mxu1 }
 0x321   :  { %v653_v23 = vadd.f32 %v1333_v21, %v1893_v18  ;;  %v821_v25 = vadd.f32 %v1389_v22, %v1898_v19  ;;  %v647_v26 = vpop.f32.mrb[31].mxu0  ;;  %v815_v27 = vpop.f32.mrb[31].mxu1 }
 0x322   :  { %1036 = vst [vmem:[#allocation11 + $0x30] sm:$0xff] %v1024_v20   ;;  %v648_v28 = vadd.f32 %v1893_v18, %v647_v26  ;;  %v816_v29 = vadd.f32 %v1898_v19, %v815_v27 }
 0x323   :  { %919 = vst [vmem:[#allocation12 + $0x78] sm:$0xff] %v821_v25 }
 0x324   :  { %v1029_v30 = vpack.c.bf16 %v653_v23, %v648_v28  ;;  %918 = vst [vmem:[#allocation12 + $0x70] sm:$0xff] %v816_v29 }
 0x325   :  { %1650 = shalt.err (!%p1647_p2)
}
 0x326   :  { %s1651_s23 = scalar_lea.hbm %s1976_s10, 2048 }
 0x327   :  { %p1652_p3 = scmp.ne.s32.totalorder %s1976_s10, %s1651_s23  ;;  %p1655_p4 = scmp.lt.u32.totalorder %s1651_s23, %s1976_s10 }
 0x329   :  { %p1657_p5 = pnand %p1655_p4, %p1652_p3 }
 0x32b   :  { %1660 = shalt.err (!%p1657_p5)
}
 0x32c   :  { %943 = dma.vmem_to_hbm [thread:$0]  %s938_s8, 2048, %s1976_s10, [#allocation13], %s1695_s25, %s1695_s25, %s1696_s26   ;;  %1037 = vst [vmem:[#allocation11 + $0x38] sm:$0xff] %v1029_v30  }
 0x32d   :  { %s1661_s5 = scalar_lea.vmem %s1932_s19, 1024  ;;  %p1666_p7 = scmp.lt.s32.totalorder %s1932_s19, %s1932_s19 }
 0x32e   :  { %p1662_p6 = scmp.ne.s32.totalorder %s1932_s19, %s1661_s5  ;;  %p1667_p8 = scmp.lt.s32.totalorder %s1661_s5, %s1661_s5 }
 0x330   :  { %p1668_p9 = por %p1667_p8, %p1666_p7 }
 0x332   :  { %p1669_p10 = pnand %p1668_p9, %p1662_p6 }
 0x334   :  { %1672 = shalt.err (!%p1669_p10)
}
 0x335   :  { %s1673_s3 = scalar_lea.hbm %s1975_s9, 1024 }
 0x336   :  { %p1674_p11 = scmp.ne.s32.totalorder %s1975_s9, %s1673_s3  ;;  %p1677_p12 = scmp.lt.u32.totalorder %s1673_s3, %s1975_s9 }
 0x338   :  { %p1679_p13 = pnand %p1677_p12, %p1674_p11 }
 0x33a   :  { %1682 = shalt.err (!%p1679_p13)
}
 0x33b   :  { %s1702_s10 = smov 64   ;;  %s1703_s25 = smov 4  }
 0x33c   :  { %931 = dma.vmem_to_hbm [thread:$0]  %s1932_s19, 1024, %s1975_s9, [#allocation4], %s1702_s10, %s1702_s10, %s1703_s25  }
 0x33d   :  { %1689 = dma.done.wait [#allocation4], 1024  }
 0x33e   :  { %1690 = vsyncadd [#allocation4], 4294966272 }
 0x33f   :  { %1691 = dma.done.wait [#allocation13], 2048  }
 0x340   :  { %1692 = vsyncadd [#allocation13], 4294965248 }
 0x341   :  { %950 = vsyncpa [#allocation3], 1 }
 0x342   :  { %951 = vsyncpa [#allocation6], 1 }
 0x343   :  { %952 = vsyncpa [#allocation9], 1 }
 0x344   :  { %953 = vsyncpa [#allocation4], 1 }
 0x345   :  { %954 = vsyncpa [#allocation13], 1 }

</bundles_post_ra>
